<compile_context>
chip_gen: v5e
topology: v5e:2x2
jax: 0.10.0
libtpu: 0.0.40
codegen_flags: <defaults>
</compile_context>

<pallas_src>
import jax
import jax.numpy as jnp
from jax.experimental import pallas as pl
from jax.experimental.pallas import tpu as pltpu

INPUT_SIZE = 100
LABEL_SIZE = 10
IN_PAD = 128              # 110 -> 128 (one lane-dense K tile for layer 1)
HIDDEN = 200
HIDDEN_PAD = 256          # 200 -> 256 (2 x 128 lanes), padded with zeros
NUM_CLASSES = 784         # 28 * 28
MAX_TILE_B = 512          # batch rows per grid step (fits v5e scoped VMEM)


def _round_up(n, m):
    return ((n + m - 1) // m) * m


def _generator_kernel(v_ref,
                      w1_ref, b1_ref,
                      w2_ref, b2_ref,
                      w3_ref, b3_ref,
                      o_ref):
    """Fused MLP tile: (Linear + LeakyReLU) x2 + Linear + Tanh, all in VMEM."""
    # Layer 1 -- single lane-aligned K=128 dot (concat + pad fused in wrapper).
    h = jnp.dot(v_ref[...], w1_ref[...], preferred_element_type=jnp.float32)
    h = h + b1_ref[...]                                     # (tb, 256), f32
    h = jnp.maximum(h, 0.2 * h)                             # LeakyReLU(0.2)

    # Layer 2
    h = jnp.dot(h.astype(jnp.bfloat16), w2_ref[...],
                preferred_element_type=jnp.float32)
    h = h + b2_ref[...]
    h = jnp.maximum(h, 0.2 * h)

    # Layer 3 + Tanh
    h = jnp.dot(h.astype(jnp.bfloat16), w3_ref[...],
                preferred_element_type=jnp.float32)         # (tb, 784)
    h = h + b3_ref[...]
    o_ref[...] = jnp.tanh(h).astype(jnp.bfloat16)           # bf16 HBM write


def generator_forward(x, y, kernel_params, *, max_tile_b=MAX_TILE_B,
                      out_dtype=jnp.bfloat16):
    """x: (B, input_size), y: (B, label_size) one-hot. Returns (B, 1, 28, 28)."""
    w1, b1, w2, b2, w3, b3 = kernel_params
    B = x.shape[0]

    # Fused [x | y | 0-pad] input block: bf16, lane-dense K = 128.
    x2 = x.reshape(B, -1).astype(jnp.bfloat16)              # (B, 100)
    y2 = y.reshape(B, -1).astype(jnp.bfloat16)              # (B, 10)
    pad = jnp.zeros((B, IN_PAD - INPUT_SIZE - LABEL_SIZE), jnp.bfloat16)
    v = jnp.concatenate([x2, y2, pad], axis=1)              # (B, 128) bf16

    # Tile the batch.  tile_b == B (full dim, always legal) for tiny batches;
    # otherwise a multiple of 8 capped at ceil(B/2) so the grid has >= 2 steps
    # and the "parallel" axis can shard across both TensorCores on v7x.
    # Pallas clips the final partial block on writeback when B % tile_b != 0.
    if B <= 8:
        tile_b = B
    else:
        tile_b = min(max_tile_b, _round_up(pl.cdiv(B, 2), 8))
    grid = (pl.cdiv(B, tile_b),)

    row_spec = lambda shape: pl.BlockSpec(shape, lambda i: (i, 0))
    # Constant block index => weights stay resident in VMEM across the grid.
    full_spec = lambda shape: pl.BlockSpec(shape, lambda i: (0, 0))

    # Advisory cost hint for XLA's scheduler (logical FLOPs, actual HBM bytes).
    flops = 2 * B * ((INPUT_SIZE + LABEL_SIZE) * HIDDEN
                     + HIDDEN * HIDDEN + HIDDEN * NUM_CLASSES)
    weight_bytes = sum(int(p.size) * p.dtype.itemsize
                       for p in (w1, b1, w2, b2, w3, b3))
    bytes_accessed = (B * IN_PAD * 2            # bf16 input read
                      + B * NUM_CLASSES * 2     # bf16 output write
                      + weight_bytes)
    cost = pl.CostEstimate(flops=flops,
                           transcendentals=B * NUM_CLASSES,
                           bytes_accessed=bytes_accessed)

    out = pl.pallas_call(
        _generator_kernel,
        out_shape=jax.ShapeDtypeStruct((B, NUM_CLASSES), jnp.bfloat16),
        grid=grid,
        in_specs=[
            row_spec((tile_b, IN_PAD)),
            full_spec(w1.shape), full_spec(b1.shape),
            full_spec(w2.shape), full_spec(b2.shape),
            full_spec(w3.shape), full_spec(b3.shape),
        ],
        out_specs=row_spec((tile_b, NUM_CLASSES)),
        compiler_params=pltpu.CompilerParams(
            dimension_semantics=("parallel",)),
        cost_estimate=cost,
    )(v, w1, b1, w2, b2, w3, b3)

    if out_dtype != jnp.bfloat16:
        out = out.astype(out_dtype)
    return out.reshape(B, 1, 28, 28)


def init_params(key):
    """PyTorch nn.Linear default init (U[-1/sqrt(fan_in), +1/sqrt(fan_in)]).
    Weights stored as (in, out) so the kernel computes x @ W + b
    (== PyTorch's x @ W.T + b). Returns f32 logical params."""
    def linear(key, fan_in, fan_out):
        kw, kb = jax.random.split(key)
        bound = 1.0 / jnp.sqrt(fan_in)
        w = jax.random.uniform(kw, (fan_in, fan_out), jnp.float32, -bound, bound)
        b = jax.random.uniform(kb, (1, fan_out), jnp.float32, -bound, bound)
        return w, b

    k1, k2, k3 = jax.random.split(key, 3)
    w1, b1 = linear(k1, INPUT_SIZE + LABEL_SIZE, HIDDEN)
    w2, b2 = linear(k2, HIDDEN, HIDDEN)
    w3, b3 = linear(k3, HIDDEN, NUM_CLASSES)
    return (w1, b1, w2, b2, w3, b3)


def prepare_kernel_params(params_f32):
    """One-time layout prep: zero-pad layer-1 input dim 110->128 (so the
    wrapper-side concat+pad feeds a single K=128 dot), zero-pad hidden
    200->256, and cast matmul weights to bf16.  Biases stay f32 (bias add /
    LeakyReLU / tanh run in f32 on the VPU/EUP)."""
    w1, b1, w2, b2, w3, b3 = params_f32
    pad_h = HIDDEN_PAD - HIDDEN
    pad_in = IN_PAD - (INPUT_SIZE + LABEL_SIZE)

    w1p = jnp.pad(w1, ((0, pad_in), (0, pad_h))).astype(jnp.bfloat16)  # (128, 256)
    b1p = jnp.pad(b1, ((0, 0), (0, pad_h)))                            # (1, 256) f32
    w2p = jnp.pad(w2, ((0, pad_h), (0, pad_h))).astype(jnp.bfloat16)   # (256, 256)
    b2p = jnp.pad(b2, ((0, 0), (0, pad_h)))                            # (1, 256) f32
    w3p = jnp.pad(w3, ((0, pad_h), (0, 0))).astype(jnp.bfloat16)       # (256, 784)
    return (w1p, b1p, w2p, b2p, w3p, b3)


def generator_reference(x, y, params_f32):
    """Pure-JAX f32 reference mirroring the PyTorch module."""
    w1, b1, w2, b2, w3, b3 = params_f32
    B = x.shape[0]
    v = jnp.concatenate([x.reshape(B, -1), y.reshape(B, -1)], axis=1)
    h = v @ w1 + b1
    h = jnp.where(h > 0, h, 0.2 * h)
    h = h @ w2 + b2
    h = jnp.where(h > 0, h, 0.2 * h)
    o = jnp.tanh(h @ w3 + b3)
    return o.reshape(B, 1, 28, 28)


if __name__ == "__main__":
    key = jax.random.PRNGKey(0)
    kp, kx, ky = jax.random.split(key, 3)

    params_f32 = init_params(kp)
    kparams = prepare_kernel_params(params_f32)

    # --- small single-tile test (B=2) ---
    B = 2
    x = jax.random.normal(kx, (B, INPUT_SIZE), jnp.float32)
    labels = jax.random.randint(ky, (B,), 0, LABEL_SIZE)
    y = jax.nn.one_hot(labels, LABEL_SIZE, dtype=jnp.float32)

    out = generator_forward(x, y, kparams)
    out = jax.block_until_ready(out)

    assert out.shape == (B, 1, 28, 28), out.shape
    assert out.dtype == jnp.bfloat16
    out_f32 = out.astype(jnp.float32)
    assert bool(jnp.all(jnp.abs(out_f32) <= 1.0))   # tanh range

    ref = generator_reference(x, y, params_f32)
    err = float(jnp.max(jnp.abs(out_f32 - ref)))
    assert err < 5e-2, err

    # --- optional f32 output path ---
    out_fp32 = generator_forward(x, y, kparams, out_dtype=jnp.float32)
    out_fp32 = jax.block_until_ready(out_fp32)
    assert out_fp32.dtype == jnp.float32

    # --- multi-tile test (exercise the batch grid with >= 2 steps) ---
    B2 = 16
    x2 = jax.random.normal(kx, (B2, INPUT_SIZE), jnp.float32)
    labels2 = jax.random.randint(ky, (B2,), 0, LABEL_SIZE)
    y2 = jax.nn.one_hot(labels2, LABEL_SIZE, dtype=jnp.float32)

    out2 = generator_forward(x2, y2, kparams, max_tile_b=8)
    out2 = jax.block_until_ready(out2)
    ref2 = generator_reference(x2, y2, params_f32)
    assert out2.shape == (B2, 1, 28, 28)
    err2 = float(jnp.max(jnp.abs(out2.astype(jnp.float32) - ref2)))
    assert err2 < 5e-2, err2

    print("KERNEL_OK")
</pallas_src>

<mosaic_0001>
module attributes {stable_mosaic.version = 11 : i64} {
  func.func @_generator_kernel(%arg0: i32, %arg1: memref<2x128xbf16, #tpu.memory_space<vmem>>, %arg2: memref<128x256xbf16, #tpu.memory_space<vmem>>, %arg3: memref<1x256xf32, #tpu.memory_space<vmem>>, %arg4: memref<256x256xbf16, #tpu.memory_space<vmem>>, %arg5: memref<1x256xf32, #tpu.memory_space<vmem>>, %arg6: memref<256x784xbf16, #tpu.memory_space<vmem>>, %arg7: memref<1x784xf32, #tpu.memory_space<vmem>>, %arg8: memref<2x784xbf16, #tpu.memory_space<vmem>>) attributes {dimension_semantics = [#tpu.dimension_semantics<parallel>], iteration_bounds = array<i64: 1>, scalar_prefetch = 0 : i64, scratch_operands = 0 : i64, tpu.core_type = #tpu.core_type<tc>, window_params = [{transform_indices = @transform_0, window_bounds = array<i64: 2, 128>}, {pipeline_mode = #tpu.pipeline_mode<synchronous>, transform_indices = @transform_1, window_bounds = array<i64: 128, 256>}, {pipeline_mode = #tpu.pipeline_mode<synchronous>, transform_indices = @transform_2, window_bounds = array<i64: 1, 256>}, {pipeline_mode = #tpu.pipeline_mode<synchronous>, transform_indices = @transform_3, window_bounds = array<i64: 256, 256>}, {pipeline_mode = #tpu.pipeline_mode<synchronous>, transform_indices = @transform_4, window_bounds = array<i64: 1, 256>}, {pipeline_mode = #tpu.pipeline_mode<synchronous>, transform_indices = @transform_5, window_bounds = array<i64: 256, 784>}, {pipeline_mode = #tpu.pipeline_mode<synchronous>, transform_indices = @transform_6, window_bounds = array<i64: 1, 784>}, {transform_indices = @transform_7, window_bounds = array<i64: 2, 784>}]} {
    %c0 = arith.constant 0 : index
    %c0_0 = arith.constant 0 : index
    %0 = vector.load %arg1[%c0, %c0_0] : memref<2x128xbf16, #tpu.memory_space<vmem>>, vector<2x128xbf16>
    %c0_1 = arith.constant 0 : index
    %c0_2 = arith.constant 0 : index
    %1 = vector.load %arg2[%c0_1, %c0_2] : memref<128x256xbf16, #tpu.memory_space<vmem>>, vector<128x256xbf16>
    %cst = arith.constant dense<0.000000e+00> : vector<2x256xf32>
    %2 = tpu.matmul %0, %1, %cst {dimension_numbers = #tpu.dot_dimension_numbers<[1], [0], [0], [1], [0, 0, 1, 1], [], []>} : vector<2x128xbf16>, vector<128x256xbf16>, vector<2x256xf32> -> vector<2x256xf32>
    %c0_3 = arith.constant 0 : index
    %c0_4 = arith.constant 0 : index
    %3 = vector.load %arg3[%c0_3, %c0_4] : memref<1x256xf32, #tpu.memory_space<vmem>>, vector<1x256xf32>
    %4 = vector.broadcast %3 : vector<1x256xf32> to vector<2x256xf32>
    %5 = arith.addf %2, %4 : vector<2x256xf32>
    %cst_5 = arith.constant 2.000000e-01 : f32
    %6 = vector.broadcast %cst_5 : f32 to vector<2x256xf32>
    %7 = arith.mulf %6, %5 : vector<2x256xf32>
    %8 = arith.maximumf %5, %7 : vector<2x256xf32>
    %9 = arith.truncf %8 : vector<2x256xf32> to vector<2x256xbf16>
    %c0_6 = arith.constant 0 : index
    %c0_7 = arith.constant 0 : index
    %10 = vector.load %arg4[%c0_6, %c0_7] : memref<256x256xbf16, #tpu.memory_space<vmem>>, vector<256x256xbf16>
    %cst_8 = arith.constant dense<0.000000e+00> : vector<2x256xf32>
    %11 = tpu.matmul %9, %10, %cst_8 {dimension_numbers = #tpu.dot_dimension_numbers<[1], [0], [0], [1], [0, 0, 1, 1], [], []>} : vector<2x256xbf16>, vector<256x256xbf16>, vector<2x256xf32> -> vector<2x256xf32>
    %c0_9 = arith.constant 0 : index
    %c0_10 = arith.constant 0 : index
    %12 = vector.load %arg5[%c0_9, %c0_10] : memref<1x256xf32, #tpu.memory_space<vmem>>, vector<1x256xf32>
    %13 = vector.broadcast %12 : vector<1x256xf32> to vector<2x256xf32>
    %14 = arith.addf %11, %13 : vector<2x256xf32>
    %cst_11 = arith.constant 2.000000e-01 : f32
    %15 = vector.broadcast %cst_11 : f32 to vector<2x256xf32>
    %16 = arith.mulf %15, %14 : vector<2x256xf32>
    %17 = arith.maximumf %14, %16 : vector<2x256xf32>
    %18 = arith.truncf %17 : vector<2x256xf32> to vector<2x256xbf16>
    %c0_12 = arith.constant 0 : index
    %c0_13 = arith.constant 0 : index
    %19 = vector.load %arg6[%c0_12, %c0_13] : memref<256x784xbf16, #tpu.memory_space<vmem>>, vector<256x784xbf16>
    %cst_14 = arith.constant dense<0.000000e+00> : vector<2x784xf32>
    %20 = tpu.matmul %18, %19, %cst_14 {dimension_numbers = #tpu.dot_dimension_numbers<[1], [0], [0], [1], [0, 0, 1, 1], [], []>} : vector<2x256xbf16>, vector<256x784xbf16>, vector<2x784xf32> -> vector<2x784xf32>
    %c0_15 = arith.constant 0 : index
    %c0_16 = arith.constant 0 : index
    %21 = vector.load %arg7[%c0_15, %c0_16] : memref<1x784xf32, #tpu.memory_space<vmem>>, vector<1x784xf32>
    %22 = vector.broadcast %21 : vector<1x784xf32> to vector<2x784xf32>
    %23 = arith.addf %20, %22 : vector<2x784xf32>
    %24 = math.tanh %23 : vector<2x784xf32>
    %25 = arith.truncf %24 : vector<2x784xf32> to vector<2x784xbf16>
    %c0_17 = arith.constant 0 : index
    %c0_18 = arith.constant 0 : index
    %26 = vector.load %arg8[%c0_17, %c0_18] : memref<2x784xbf16, #tpu.memory_space<vmem>>, vector<2x784xbf16>
    tpu.vector_store %arg8[%c0_17, %c0_18], %25 {strides = array<i32>} : memref<2x784xbf16, #tpu.memory_space<vmem>>, vector<2x784xbf16>,
    return
  }
  func.func @transform_0(%arg0: i32) -> (i32, i32) {
    %c0_i32 = arith.constant 0 : i32
    %c0_i32_0 = arith.constant 0 : i32
    return %arg0, %c0_i32 : i32, i32
  }
  func.func @transform_1(%arg0: i32) -> (i32, i32) {
    %c0_i32 = arith.constant 0 : i32
    %c0_i32_0 = arith.constant 0 : i32
    %c0_i32_1 = arith.constant 0 : i32
    return %c0_i32, %c0_i32_0 : i32, i32
  }
  func.func @transform_2(%arg0: i32) -> (i32, i32) {
    %c0_i32 = arith.constant 0 : i32
    %c0_i32_0 = arith.constant 0 : i32
    %c0_i32_1 = arith.constant 0 : i32
    return %c0_i32, %c0_i32_0 : i32, i32
  }
  func.func @transform_3(%arg0: i32) -> (i32, i32) {
    %c0_i32 = arith.constant 0 : i32
    %c0_i32_0 = arith.constant 0 : i32
    %c0_i32_1 = arith.constant 0 : i32
    return %c0_i32, %c0_i32_0 : i32, i32
  }
  func.func @transform_4(%arg0: i32) -> (i32, i32) {
    %c0_i32 = arith.constant 0 : i32
    %c0_i32_0 = arith.constant 0 : i32
    %c0_i32_1 = arith.constant 0 : i32
    return %c0_i32, %c0_i32_0 : i32, i32
  }
  func.func @transform_5(%arg0: i32) -> (i32, i32) {
    %c0_i32 = arith.constant 0 : i32
    %c0_i32_0 = arith.constant 0 : i32
    %c0_i32_1 = arith.constant 0 : i32
    return %c0_i32, %c0_i32_0 : i32, i32
  }
  func.func @transform_6(%arg0: i32) -> (i32, i32) {
    %c0_i32 = arith.constant 0 : i32
    %c0_i32_0 = arith.constant 0 : i32
    %c0_i32_1 = arith.constant 0 : i32
    return %c0_i32, %c0_i32_0 : i32, i32
  }
  func.func @transform_7(%arg0: i32) -> (i32, i32) {
    %c0_i32 = arith.constant 0 : i32
    %c0_i32_0 = arith.constant 0 : i32
    return %arg0, %c0_i32 : i32, i32
  }
}

</mosaic_0001>

<bundles_post_ra>
// kernel: tpu_custom_call.1
= control target key start
LH: loop header
LB: loop body
LE: loop exit
PB: predicated region body
PF: predicated region fallthrough
CT: control target
= control target key end

     0   :  { %s3278_s0 = inlined_call_operand.vmem [shape: bf16[2,128], index: 0, kind: input, shape index: {}]   ;;  %s3279_s1 = inlined_call_operand.vmem [shape: bf16[128,256], index: 1, kind: input, shape index: {}]   ;;  %s3280_s2 = inlined_call_operand.vmem [shape: f32[1,256], index: 2, kind: input, shape index: {}]   ;;  %s3281_s3 = inlined_call_operand.vmem [shape: bf16[256,256], index: 3, kind: input, shape index: {}]   ;;  %s3282_s4 = inlined_call_operand.vmem [shape: f32[1,256], index: 4, kind: input, shape index: {}]   ;;  %s3283_s5 = inlined_call_operand.vmem [shape: bf16[256,784], index: 5, kind: input, shape index: {}]   ;;  %s3284_s6 = inlined_call_operand.vmem [shape: f32[1,784], index: 6, kind: input, shape index: {}]   ;;  %s3285_s7 = inlined_call_operand.hbm [shape: bf16[2,784], index: 7, kind: output, shape index: {}]  }
   0x1   :  { %v1450_v0 = vld [vmem:[%s3279_s1 + $0x70] sm:$0xf]  ;;  %v2047_v1 = vld [vmem:[%s3279_s1 + $0x74] sm:$0xf0]  ;;  %v2046_v2 = vld [vmem:[%s3279_s1 + $0x74] sm:$0xf] }
   0x2   :  { %v1451_v3 = vor.u32 %v2047_v1, %v1450_v0  ;;  %v1452_v4 = vld [vmem:[%s3279_s1 + $0x78] sm:$0xf0]  ;;  %v1442_v5 = vld [vmem:[%s3279_s1 + $0x60] sm:$0xf]  ;;  %v2045_v6 = vld [vmem:[%s3279_s1 + $0x64] sm:$0xf0] }
   0x3   :  { %v1455_v7 = vor.u32 %v2046_v2, %v1452_v4  ;;  %v2044_v8 = vld [vmem:[%s3279_s1 + $0x64] sm:$0xf]  ;;  %v1444_v9 = vld [vmem:[%s3279_s1 + $0x68] sm:$0xf0]  ;;  %v1443_v10 = vor.u32 %v2045_v6, %v1442_v5  ;;  %v1434_v12 = vld [vmem:[%s3279_s1 + $0x50] sm:$0xf] }
   0x4   :  { %130 = vmatpush.bf16.msra.mxu0 %v1451_v3  ;;  %v1447_v11 = vor.u32 %v2044_v8, %v1444_v9  ;;  %v2043_v13 = vld [vmem:[%s3279_s1 + $0x54] sm:$0xf0]  ;;  %v2042_v14 = vld [vmem:[%s3279_s1 + $0x54] sm:$0xf]  ;;  %v1436_v15 = vld [vmem:[%s3279_s1 + $0x58] sm:$0xf0] }
   0x5   :  { %143 = vmatpush.bf16.msra.mxu1 %v1455_v7  ;;  %v1435_v16 = vor.u32 %v2043_v13, %v1434_v12  ;;  %v1439_v17 = vor.u32 %v2042_v14, %v1436_v15  ;;  %v1426_v18 = vld [vmem:[%s3279_s1 + $0x40] sm:$0xf]  ;;  %v2041_v19 = vld [vmem:[%s3279_s1 + $0x44] sm:$0xf0]  ;;  %v2040_v20 = vld [vmem:[%s3279_s1 + $0x44] sm:$0xf] }
   0x6   :  { %v1428_v21 = vld [vmem:[%s3279_s1 + $0x48] sm:$0xf0]  ;;  %v1427_v22 = vor.u32 %v2041_v19, %v1426_v18  ;;  %v1514_v23 = vld [vmem:[%s3281_s3 + $0x70] sm:$0xf]  ;;  %v2063_v24 = vld [vmem:[%s3281_s3 + $0x74] sm:$0xf0] }
   0x7   :  { %v1578_v25 = vld [vmem:[%s3281_s3 + $0xf0] sm:$0xf]  ;;  %v1431_v26 = vor.u32 %v2040_v20, %v1428_v21  ;;  %v2039_v28 = vld [vmem:[%s3279_s1 + $0x34] sm:$0xf0]  ;;  %v1515_v29 = vor.u32 %v2063_v24, %v1514_v23  ;;  %v2038_v31 = vld [vmem:[%s3279_s1 + $0x34] sm:$0xf] }
   0x8   :  { %131 = vmatpush.bf16.msra.mxu0 %v1443_v10  ;;  %v1418_v27 = vld [vmem:[%s3279_s1 + $0x30] sm:$0xf]  ;;  %v2079_v30 = vld [vmem:[%s3281_s3 + $0xf4] sm:$0xf0]  ;;  %v1420_v32 = vld [vmem:[%s3279_s1 + $0x38] sm:$0xf0] }
   0x9   :  { %144 = vmatpush.bf16.msra.mxu1 %v1447_v11  ;;  %v1579_v33 = vor.u32 %v2079_v30, %v1578_v25  ;;  %v1506_v34 = vld [vmem:[%s3281_s3 + $0x60] sm:$0xf]  ;;  %360 = vmatpush.bf16.msra.mxu2 %v1515_v29  ;;  %v2061_v35 = vld [vmem:[%s3281_s3 + $0x64] sm:$0xf0]  ;;  %v1419_v38 = vor.u32 %v2039_v28, %v1418_v27  ;;  %v1423_v43 = vor.u32 %v2038_v31, %v1420_v32  ;;  %v2036_v44 = vld [vmem:[%s3279_s1 + $0x24] sm:$0xf] }
   0xa   :  { %v1570_v36 = vld [vmem:[%s3281_s3 + $0xe0] sm:$0xf]  ;;  %v2077_v37 = vld [vmem:[%s3281_s3 + $0xe4] sm:$0xf0]  ;;  %v1507_v41 = vor.u32 %v2061_v35, %v1506_v34  ;;  %v1498_v45 = vld [vmem:[%s3281_s3 + $0x50] sm:$0xf] }
   0xb   :  { %v1410_v39 = vld [vmem:[%s3279_s1 + $0x20] sm:$0xf]  ;;  %v2037_v40 = vld [vmem:[%s3279_s1 + $0x24] sm:$0xf0]  ;;  %373 = vmatpush.bf16.msra.mxu3 %v1579_v33  ;;  %v1571_v42 = vor.u32 %v2077_v37, %v1570_v36  ;;  %v2059_v46 = vld [vmem:[%s3281_s3 + $0x54] sm:$0xf0] }
   0xc   :  { %132 = vmatpush.bf16.msra.mxu0 %v1435_v16  ;;  %v1412_v47 = vld [vmem:[%s3279_s1 + $0x28] sm:$0xf0]  ;;  %v1562_v48 = vld [vmem:[%s3281_s3 + $0xd0] sm:$0xf]  ;;  %v2075_v49 = vld [vmem:[%s3281_s3 + $0xd4] sm:$0xf0]  ;;  %v1499_v50 = vor.u32 %v2059_v46, %v1498_v45  ;;  %v1411_v51 = vor.u32 %v2037_v40, %v1410_v39 }
   0xd   :  { %145 = vmatpush.bf16.msra.mxu1 %v1439_v17  ;;  %361 = vmatpush.bf16.msra.mxu2 %v1507_v41  ;;  %v1402_v52 = vld [vmem:[%s3279_s1 + $0x10] sm:$0xf]  ;;  %v1563_v53 = vor.u32 %v2075_v49, %v1562_v48  ;;  %v1490_v54 = vld [vmem:[%s3281_s3 + $0x40] sm:$0xf]  ;;  %v2057_v55 = vld [vmem:[%s3281_s3 + $0x44] sm:$0xf0]  ;;  %v1415_v56 = vor.u32 %v2036_v44, %v1412_v47 }
   0xe   :  { %v2035_v57 = vld [vmem:[%s3279_s1 + $0x14] sm:$0xf0]  ;;  %v1554_v58 = vld [vmem:[%s3281_s3 + $0xc0] sm:$0xf]  ;;  %v2073_v59 = vld [vmem:[%s3281_s3 + $0xc4] sm:$0xf0]  ;;  %v1491_v63 = vor.u32 %v2057_v55, %v1490_v54 }
   0xf   :  { %374 = vmatpush.bf16.msra.mxu3 %v1571_v42  ;;  %v2034_v60 = vld [vmem:[%s3279_s1 + $0x14] sm:$0xf]  ;;  %v1404_v61 = vld [vmem:[%s3279_s1 + $0x18] sm:$0xf0]  ;;  %v1394_v62 = vld [vmem:[%s3279_s1] sm:$0xf]  ;;  %v1403_v0 = vor.u32 %v2035_v57, %v1402_v52  ;;  %v1555_v2 = vor.u32 %v2073_v59, %v1554_v58 }
  0x10   :  { %133 = vmatpush.bf16.msra.mxu0 %v1427_v22  ;;  %v2033_v1 = vld [vmem:[%s3279_s1 + $0x4] sm:$0xf0]  ;;  %v1482_v3 = vld [vmem:[%s3281_s3 + $0x30] sm:$0xf]  ;;  %v2055_v4 = vld [vmem:[%s3281_s3 + $0x34] sm:$0xf0]  ;;  %v1407_v5 = vor.u32 %v2034_v60, %v1404_v61 }
  0x11   :  { %146 = vmatpush.bf16.msra.mxu1 %v1431_v26  ;;  %362 = vmatpush.bf16.msra.mxu2 %v1499_v50  ;;  %v2032_v6 = vld [vmem:[%s3279_s1 + $0x4] sm:$0xf]  ;;  %v1546_v7 = vld [vmem:[%s3281_s3 + $0xb0] sm:$0xf]  ;;  %v2071_v8 = vld [vmem:[%s3281_s3 + $0xb4] sm:$0xf0]  ;;  %v1483_v14 = vor.u32 %v2055_v4, %v1482_v3  ;;  %v1395_v15 = vor.u32 %v2033_v1, %v1394_v62 }
  0x12   :  { %v1396_v9 = vld [vmem:[%s3279_s1 + $0x8] sm:$0xf0]  ;;  %v2062_v10 = vld [vmem:[%s3281_s3 + $0x74] sm:$0xf]  ;;  %v1516_v11 = vld [vmem:[%s3281_s3 + $0x78] sm:$0xf0]  ;;  %v1547_v16 = vor.u32 %v2071_v8, %v1546_v7 }
  0x13   :  { %375 = vmatpush.bf16.msra.mxu3 %v1563_v53  ;;  %v2078_v12 = vld [vmem:[%s3281_s3 + $0xf4] sm:$0xf]  ;;  %v1580_v13 = vld [vmem:[%s3281_s3 + $0xf8] sm:$0xf0]  ;;  %v1474_v17 = vld [vmem:[%s3281_s3 + $0x20] sm:$0xf] }
  0x14   :  { %134 = vmatpush.bf16.msra.mxu0 %v1419_v38  ;;  %v2053_v18 = vld [vmem:[%s3281_s3 + $0x24] sm:$0xf0] }
  0x15   :  { %147 = vmatpush.bf16.msra.mxu1 %v1423_v43  ;;  %363 = vmatpush.bf16.msra.mxu2 %v1491_v63 }
  0x17   :  { %376 = vmatpush.bf16.msra.mxu3 %v1555_v2 }
  0x18   :  { %135 = vmatpush.bf16.msra.mxu0 %v1411_v51 }
  0x19   :  { %148 = vmatpush.bf16.msra.mxu1 %v1415_v56 }
  0x1c   :  { %136 = vmatpush.bf16.msra.mxu0 %v1403_v0 }
  0x1d   :  { %12 = vsyncpa [#allocation3], 0  ;;  %149 = vmatpush.bf16.msra.mxu1 %v1407_v5  ;;  %v1399_v19 = vor.u32 %v2032_v6, %v1396_v9  ;;  %v1519_v20 = vor.u32 %v2062_v10, %v1516_v11  ;;  %v1538_v21 = vld [vmem:[%s3281_s3 + $0xa0] sm:$0xf]  ;;  %v2069_v22 = vld [vmem:[%s3281_s3 + $0xa4] sm:$0xf0]  ;;  %v1583_v23 = vor.u32 %v2078_v12, %v1580_v13  ;;  %364 = vmatpush.bf16.msra.mxu2 %v1483_v14 }
  0x1e   :  { %v2060_v24 = vld [vmem:[%s3281_s3 + $0x64] sm:$0xf]  ;;  %v1508_v25 = vld [vmem:[%s3281_s3 + $0x68] sm:$0xf0]  ;;  %v1475_v28 = vor.u32 %v2053_v18, %v1474_v17  ;;  %v27_v29 = vld [vmem:[%s3278_s0] sm:$0x1]  ;;  %377 = vmatpush.bf16.msra.mxu3 %v1547_v16  ;;  %v1539_v30 = vor.u32 %v2069_v22, %v1538_v21 }
  0x1f   :  { %v2076_v26 = vld [vmem:[%s3281_s3 + $0xe4] sm:$0xf]  ;;  %v1572_v27 = vld [vmem:[%s3281_s3 + $0xe8] sm:$0xf0]  ;;  %v1511_v31 = vor.u32 %v2060_v24, %v1508_v25  ;;  %v2058_v33 = vld [vmem:[%s3281_s3 + $0x54] sm:$0xf] }
  0x20   :  { %137 = vmatpush.bf16.msra.mxu0 %v1395_v15  ;;  %v1575_v32 = vor.u32 %v2076_v26, %v1572_v27  ;;  %v1500_v34 = vld [vmem:[%s3281_s3 + $0x58] sm:$0xf0]  ;;  %v2074_v35 = vld [vmem:[%s3281_s3 + $0xd4] sm:$0xf]  ;;  %v2056_v39 = vld [vmem:[%s3281_s3 + $0x44] sm:$0xf] }
  0x21   :  { %150 = vmatpush.bf16.msra.mxu1 %v1399_v19  ;;  %v1564_v36 = vld [vmem:[%s3281_s3 + $0xd8] sm:$0xf0]  ;;  %365 = vmatpush.bf16.msra.mxu2 %v1475_v28  ;;  %v1503_v37 = vor.u32 %v2058_v33, %v1500_v34  ;;  %v1492_v40 = vld [vmem:[%s3281_s3 + $0x48] sm:$0xf0]  ;;  %v2072_v41 = vld [vmem:[%s3281_s3 + $0xc4] sm:$0xf] }
  0x22   :  { %378 = vmatpush.bf16.msra.mxu3 %v1539_v30  ;;  %v1567_v38 = vor.u32 %v2074_v35, %v1564_v36  ;;  %v1556_v42 = vld [vmem:[%s3281_s3 + $0xc8] sm:$0xf0]  ;;  %v1495_v43 = vor.u32 %v2056_v39, %v1492_v40  ;;  %v2054_v45 = vld [vmem:[%s3281_s3 + $0x34] sm:$0xf]  ;;  %v1484_v46 = vld [vmem:[%s3281_s3 + $0x38] sm:$0xf0] }
  0x23   :  { %138 = vmatmul.bf16.vlgmr.msra.gmra.mxu0 %v27_v29  ;;  %v1559_v44 = vor.u32 %v2072_v41, %v1556_v42  ;;  %v2070_v47 = vld [vmem:[%s3281_s3 + $0xb4] sm:$0xf]  ;;  %v1548_v48 = vld [vmem:[%s3281_s3 + $0xb8] sm:$0xf0]  ;;  %v1487_v49 = vor.u32 %v2054_v45, %v1484_v46  ;;  %v2052_v51 = vld [vmem:[%s3281_s3 + $0x24] sm:$0xf] }
  0x24   :  { %386 = vmatpush.bf16.msrb.mxu0 %v1519_v20  ;;  %151 = vmatmul.bf16.vlgmr.msra.gmra.mxu1 %v27_v29  ;;  %v1551_v50 = vor.u32 %v2070_v47, %v1548_v48  ;;  %v1476_v52 = vld [vmem:[%s3281_s3 + $0x28] sm:$0xf0]  ;;  %v2068_v53 = vld [vmem:[%s3281_s3 + $0xa4] sm:$0xf]  ;;  %v1466_v57 = vld [vmem:[%s3281_s3 + $0x10] sm:$0xf] }
  0x25   :  { %399 = vmatpush.bf16.msrb.mxu1 %v1583_v23  ;;  %v1540_v54 = vld [vmem:[%s3281_s3 + $0xa8] sm:$0xf0]  ;;  %v1479_v55 = vor.u32 %v2052_v51, %v1476_v52  ;;  %v2051_v58 = vld [vmem:[%s3281_s3 + $0x14] sm:$0xf0]  ;;  %v1530_v60 = vld [vmem:[%s3281_s3 + $0x90] sm:$0xf] }
  0x26   :  { %v1543_v56 = vor.u32 %v2068_v53, %v1540_v54  ;;  %v1467_v59 = vor.u32 %v2051_v58, %v1466_v57  ;;  %v2067_v61 = vld [vmem:[%s3281_s3 + $0x94] sm:$0xf0]  ;;  %v2050_v62 = vld [vmem:[%s3281_s3 + $0x14] sm:$0xf]  ;;  %v1468_v0 = vld [vmem:[%s3281_s3 + $0x18] sm:$0xf0] }
  0x27   :  { %v1531_v63 = vor.u32 %v2067_v61, %v1530_v60  ;;  %v2066_v1 = vld [vmem:[%s3281_s3 + $0x94] sm:$0xf]  ;;  %v1532_v2 = vld [vmem:[%s3281_s3 + $0x98] sm:$0xf0]  ;;  %v1471_v3 = vor.u32 %v2050_v62, %v1468_v0  ;;  %v1458_v5 = vld [vmem:[%s3281_s3] sm:$0xf] }
  0x28   :  { %387 = vmatpush.bf16.msrb.mxu0 %v1511_v31  ;;  %366 = vmatpush.bf16.msra.mxu2 %v1467_v59  ;;  %v1535_v4 = vor.u32 %v2066_v1, %v1532_v2  ;;  %v2049_v6 = vld [vmem:[%s3281_s3 + $0x4] sm:$0xf0]  ;;  %v1522_v7 = vld [vmem:[%s3281_s3 + $0x80] sm:$0xf]  ;;  %v2048_v10 = vld [vmem:[%s3281_s3 + $0x4] sm:$0xf] }
  0x29   :  { %400 = vmatpush.bf16.msrb.mxu1 %v1575_v32  ;;  %379 = vmatpush.bf16.msra.mxu3 %v1531_v63  ;;  %v1459_v8 = vor.u32 %v2049_v6, %v1458_v5  ;;  %v2065_v9 = vld [vmem:[%s3281_s3 + $0x84] sm:$0xf0]  ;;  %v1460_v11 = vld [vmem:[%s3281_s3 + $0x8] sm:$0xf0]  ;;  %v2064_v14 = vld [vmem:[%s3281_s3 + $0x84] sm:$0xf] }
  0x2a   :  { %v1523_v12 = vor.u32 %v2065_v9, %v1522_v7  ;;  %v1463_v13 = vor.u32 %v2048_v10, %v1460_v11  ;;  %v1524_v15 = vld [vmem:[%s3281_s3 + $0x88] sm:$0xf0]  ;;  %v2006_v17 = vld [vmem:[%s3283_s5 + $0x348] sm:$0xf]  ;;  %v2188_v18 = vld [vmem:[%s3283_s5 + $0x360] sm:$0xf0] }
  0x2b   :  { %v1527_v16 = vor.u32 %v2064_v14, %v1524_v15  ;;  %v2185_v19 = vld [vmem:[%s3283_s5 + $0x34c] sm:$0xf]  ;;  %v2007_v20 = vor.u32 %v2188_v18, %v2006_v17  ;;  %v2008_v21 = vld [vmem:[%s3283_s5 + $0x364] sm:$0xf0]  ;;  %v1978_v22 = vld [vmem:[%s3283_s5 + $0x310] sm:$0xf] }
  0x2c   :  { %388 = vmatpush.bf16.msrb.mxu0 %v1503_v37  ;;  %367 = vmatpush.bf16.msra.mxu2 %v1459_v8  ;;  %v2181_v23 = vld [vmem:[%s3283_s5 + $0x328] sm:$0xf0]  ;;  %v2011_v24 = vor.u32 %v2185_v19, %v2008_v21  ;;  %v2178_v25 = vld [vmem:[%s3283_s5 + $0x314] sm:$0xf]  ;;  %v1980_v26 = vld [vmem:[%s3283_s5 + $0x32c] sm:$0xf0] }
  0x2d   :  { %401 = vmatpush.bf16.msrb.mxu1 %v1567_v38  ;;  %380 = vmatpush.bf16.msra.mxu3 %v1523_v12  ;;  %v1782_v27 = vld [vmem:[%s3283_s5 + $0x188] sm:$0xf]  ;;  %v1979_v28 = vor.u32 %v2181_v23, %v1978_v22  ;;  %v2132_v29 = vld [vmem:[%s3283_s5 + $0x1a0] sm:$0xf0]  ;;  %v2129_v30 = vld [vmem:[%s3283_s5 + $0x18c] sm:$0xf]  ;;  %v1983_v32 = vor.u32 %v2178_v25, %v1980_v26 }
  0x2e   :  { %v1784_v31 = vld [vmem:[%s3283_s5 + $0x1a4] sm:$0xf0]  ;;  %v1783_v33 = vor.u32 %v2132_v29, %v1782_v27  ;;  %v1950_v35 = vld [vmem:[%s3283_s5 + $0x2d8] sm:$0xf]  ;;  %v2174_v36 = vld [vmem:[%s3283_s5 + $0x2f0] sm:$0xf0] }
  0x2f   :  { %v1787_v34 = vor.u32 %v2129_v30, %v1784_v31  ;;  %v2171_v37 = vld [vmem:[%s3283_s5 + $0x2dc] sm:$0xf]  ;;  %v1952_v38 = vld [vmem:[%s3283_s5 + $0x2f4] sm:$0xf0]  ;;  %v1754_v39 = vld [vmem:[%s3283_s5 + $0x150] sm:$0xf] }
  0x30   :  { %389 = vmatpush.bf16.msrb.mxu0 %v1495_v43  ;;  %v2125_v40 = vld [vmem:[%s3283_s5 + $0x168] sm:$0xf0]  ;;  %1138 = vmatpush.bf16.msrb.mxu2 %v1783_v33  ;;  %v2122_v42 = vld [vmem:[%s3283_s5 + $0x154] sm:$0xf]  ;;  %v1756_v43 = vld [vmem:[%s3283_s5 + $0x16c] sm:$0xf0]  ;;  %v1955_v48 = vor.u32 %v2171_v37, %v1952_v38 }
  0x31   :  { %402 = vmatpush.bf16.msrb.mxu1 %v1559_v44  ;;  %1151 = vmatpush.bf16.msrb.mxu3 %v2007_v20  ;;  %v1755_v41 = vor.u32 %v2125_v40, %v1754_v39  ;;  %v1951_v44 = vor.u32 %v2174_v36, %v1950_v35  ;;  %v1759_v45 = vor.u32 %v2122_v42, %v1756_v43  ;;  %v1922_v46 = vld [vmem:[%s3283_s5 + $0x2a0] sm:$0xf]  ;;  %v2167_v47 = vld [vmem:[%s3283_s5 + $0x2b8] sm:$0xf0]  ;;  %v2164_v52 = vld [vmem:[%s3283_s5 + $0x2a4] sm:$0xf] }
  0x32   :  { %v2115_v51 = vld [vmem:[%s3283_s5 + $0x11c] sm:$0xf]  ;;  %v1924_v53 = vld [vmem:[%s3283_s5 + $0x2bc] sm:$0xf0]  ;;  %v1728_v54 = vld [vmem:[%s3283_s5 + $0x134] sm:$0xf0]  ;;  %v1923_v58 = vor.u32 %v2167_v47, %v1922_v46 }
  0x33   :  { %v1698_v57 = vld [vmem:[%s3283_s5 + $0xe0] sm:$0xf]  ;;  %v2111_v59 = vld [vmem:[%s3283_s5 + $0xf8] sm:$0xf0]  ;;  %v2108_v60 = vld [vmem:[%s3283_s5 + $0xe4] sm:$0xf]  ;;  %v1927_v62 = vor.u32 %v2164_v52, %v1924_v53 }
  0x34   :  { %390 = vmatpush.bf16.msrb.mxu0 %v1487_v49  ;;  %v1726_v49 = vld [vmem:[%s3283_s5 + $0x118] sm:$0xf]  ;;  %1139 = vmatpush.bf16.msrb.mxu2 %v1755_v41  ;;  %v1700_v61 = vld [vmem:[%s3283_s5 + $0xfc] sm:$0xf0]  ;;  %v1894_v63 = vld [vmem:[%s3283_s5 + $0x268] sm:$0xf] }
  0x35   :  { %403 = vmatpush.bf16.msrb.mxu1 %v1551_v50  ;;  %1152 = vmatpush.bf16.msrb.mxu3 %v1979_v28  ;;  %v2118_v50 = vld [vmem:[%s3283_s5 + $0x130] sm:$0xf0]  ;;  %v2160_v0 = vld [vmem:[%s3283_s5 + $0x280] sm:$0xf0]  ;;  %v2157_v1 = vld [vmem:[%s3283_s5 + $0x26c] sm:$0xf]  ;;  %v1703_v5 = vor.u32 %v2108_v60, %v1700_v61 }
  0x36   :  { %v1896_v2 = vld [vmem:[%s3283_s5 + $0x284] sm:$0xf0]  ;;  %v1895_v7 = vor.u32 %v2160_v0, %v1894_v63  ;;  %v2104_v8 = vld [vmem:[%s3283_s5 + $0xc0] sm:$0xf0]  ;;  %v2101_v9 = vld [vmem:[%s3283_s5 + $0xac] sm:$0xf] }
  0x37   :  { %v1670_v6 = vld [vmem:[%s3283_s5 + $0xa8] sm:$0xf]  ;;  %v1899_v11 = vor.u32 %v2157_v1, %v1896_v2  ;;  %v1866_v12 = vld [vmem:[%s3283_s5 + $0x230] sm:$0xf]  ;;  %v2150_v14 = vld [vmem:[%s3283_s5 + $0x234] sm:$0xf] }
  0x38   :  { %391 = vmatpush.bf16.msrb.mxu0 %v1479_v55  ;;  %v1727_v55 = vor.u32 %v2118_v50, %v1726_v49  ;;  %v1672_v10 = vld [vmem:[%s3283_s5 + $0xc4] sm:$0xf0]  ;;  %v1868_v15 = vld [vmem:[%s3283_s5 + $0x24c] sm:$0xf0]  ;;  %v1671_v17 = vor.u32 %v2104_v8, %v1670_v6  ;;  %v2097_v21 = vld [vmem:[%s3283_s5 + $0x88] sm:$0xf0] }
  0x39   :  { %404 = vmatpush.bf16.msrb.mxu1 %v1543_v56  ;;  %v1731_v56 = vor.u32 %v2115_v51, %v1728_v54  ;;  %1153 = vmatpush.bf16.msrb.mxu3 %v1951_v44  ;;  %v1675_v18 = vor.u32 %v2101_v9, %v1672_v10  ;;  %v1642_v19 = vld [vmem:[%s3283_s5 + $0x70] sm:$0xf]  ;;  %v2094_v22 = vld [vmem:[%s3283_s5 + $0x74] sm:$0xf]  ;;  %v1871_v25 = vor.u32 %v2150_v14, %v1868_v15  ;;  %v1838_v26 = vld [vmem:[%s3283_s5 + $0x1f8] sm:$0xf] }
  0x3a   :  { %1140 = vmatpush.bf16.msrb.mxu2 %v1727_v55  ;;  %v1644_v23 = vld [vmem:[%s3283_s5 + $0x8c] sm:$0xf0]  ;;  %v2146_v27 = vld [vmem:[%s3283_s5 + $0x210] sm:$0xf0]  ;;  %v2143_v28 = vld [vmem:[%s3283_s5 + $0x1fc] sm:$0xf]  ;;  %v1643_v31 = vor.u32 %v2097_v21, %v1642_v19 }
  0x3b   :  { %v1840_v29 = vld [vmem:[%s3283_s5 + $0x214] sm:$0xf0]  ;;  %v1839_v36 = vor.u32 %v2146_v27, %v1838_v26  ;;  %v2090_v37 = vld [vmem:[%s3283_s5 + $0x50] sm:$0xf0]  ;;  %v2087_v38 = vld [vmem:[%s3283_s5 + $0x3c] sm:$0xf] }
  0x3c   :  { %392 = vmatpush.bf16.msrb.mxu0 %v1471_v3  ;;  %v44_v3 = vld [vmem:[%s3280_s2] sm:$0x3]  ;;  %v1614_v33 = vld [vmem:[%s3283_s5 + $0x38] sm:$0xf]  ;;  %v1843_v41 = vor.u32 %v2143_v28, %v1840_v29  ;;  %v2139_v43 = vld [vmem:[%s3283_s5 + $0x1d8] sm:$0xf0] }
  0x3d   :  { %405 = vmatpush.bf16.msrb.mxu1 %v1535_v4  ;;  %v1699_v4 = vor.u32 %v2111_v59, %v1698_v57  ;;  %1154 = vmatpush.bf16.msrb.mxu3 %v1923_v58  ;;  %v1616_v39 = vld [vmem:[%s3283_s5 + $0x54] sm:$0xf0]  ;;  %v1810_v42 = vld [vmem:[%s3283_s5 + $0x1c0] sm:$0xf]  ;;  %v2136_v44 = vld [vmem:[%s3283_s5 + $0x1c4] sm:$0xf]  ;;  %v1615_v50 = vor.u32 %v2090_v37, %v1614_v33 }
  0x3e   :  { %v1812_v46 = vld [vmem:[%s3283_s5 + $0x1dc] sm:$0xf0]  ;;  %v2014_v47 = vld [vmem:[%s3283_s5 + $0x350] sm:$0xf]  ;;  %v2189_v49 = vld [vmem:[%s3283_s5 + $0x368] sm:$0xf0]  ;;  %v1619_v52 = vor.u32 %v2087_v38, %v1616_v39 }
  0x3f   :  { %1141 = vmatpush.bf16.msrb.mxu2 %v1699_v4  ;;  %v2186_v51 = vld [vmem:[%s3283_s5 + $0x354] sm:$0xf]  ;;  %v2016_v54 = vld [vmem:[%s3283_s5 + $0x36c] sm:$0xf0]  ;;  %v1586_v55 = vld [vmem:[%s3283_s5] sm:$0xf]  ;;  %v1815_v63 = vor.u32 %v2136_v44, %v1812_v46 }
  0x40   :  { %393 = vmatpush.bf16.msrb.mxu0 %v1463_v13  ;;  %v2153_v13 = vld [vmem:[%s3283_s5 + $0x248] sm:$0xf0]  ;;  %v2080_v58 = vld [vmem:[%s3283_s5 + $0x4] sm:$0xf]  ;;  %v1588_v59 = vld [vmem:[%s3283_s5 + $0x1c] sm:$0xf0]  ;;  %v2019_v6 = vor.u32 %v2186_v51, %v2016_v54 }
  0x41   :  { %406 = vmatpush.bf16.msrb.mxu1 %v1527_v16  ;;  %v46_v16 = vperm.slane %v44_v3, 0  ;;  %1155 = vmatpush.bf16.msrb.mxu3 %v1895_v7  ;;  %v1867_v20 = vor.u32 %v2153_v13, %v1866_v12  ;;  %v1790_v60 = vld [vmem:[%s3283_s5 + $0x190] sm:$0xf]  ;;  %v2133_v0 = vld [vmem:[%s3283_s5 + $0x1a8] sm:$0xf0]  ;;  %v1591_v13 = vor.u32 %v2080_v58, %v1588_v59  ;;  %vm1365_vm0 = vcmask 1041409  }
  0x42   :  { %v2130_v1 = vld [vmem:[%s3283_s5 + $0x194] sm:$0xf]  ;;  %v1792_v2 = vld [vmem:[%s3283_s5 + $0x1ac] sm:$0xf0]  ;;  %v1986_v7 = vld [vmem:[%s3283_s5 + $0x318] sm:$0xf]  ;;  %v1791_v14 = vor.u32 %v2133_v0, %v1790_v60 }
  0x43   :  { %1142 = vmatpush.bf16.msrb.mxu2 %v1671_v17  ;;  %v2182_v9 = vld [vmem:[%s3283_s5 + $0x330] sm:$0xf0]  ;;  %v1988_v12 = vld [vmem:[%s3283_s5 + $0x334] sm:$0xf0]  ;;  %v1795_v15 = vor.u32 %v2130_v1, %v1792_v2  ;;  %v1734_v28 = vld [vmem:[%s3283_s5 + $0x120] sm:$0xf] }
  0x44   :  { %1164 = vmatpush.bf16.msra.mxu0 %v1787_v34  ;;  %v2126_v17 = vld [vmem:[%s3283_s5 + $0x170] sm:$0xf0]  ;;  %v1764_v19 = vld [vmem:[%s3283_s5 + $0x174] sm:$0xf0]  ;;  %v2119_v29 = vld [vmem:[%s3283_s5 + $0x138] sm:$0xf0] }
  0x45   :  { %1177 = vmatpush.bf16.msra.mxu1 %v2011_v24  ;;  %v47_v24 = vperm.slane %v44_v3, 1  ;;  %1156 = vmatpush.bf16.msrb.mxu3 %v1867_v20  ;;  %v1987_v20 = vor.u32 %v2182_v9, %v1986_v7  ;;  %v1932_v37 = vld [vmem:[%s3283_s5 + $0x2c4] sm:$0xf0]  ;;  %v1735_v38 = vor.u32 %v2119_v29, %v1734_v28  ;;  %v2158_v44 = vld [vmem:[%s3283_s5 + $0x274] sm:$0xf]  ;;  %vm1342_vm1 = vcmask 1040384  }
  0x46   :  { %v2109_v51 = vld [vmem:[%s3283_s5 + $0xec] sm:$0xf]  ;;  %v1874_v54 = vld [vmem:[%s3283_s5 + $0x238] sm:$0xf]  ;;  %v1678_v60 = vld [vmem:[%s3283_s5 + $0xb0] sm:$0xf] }
  0x47   :  { %1143 = vmatpush.bf16.msrb.mxu2 %v1643_v31  ;;  %v1736_v31 = vld [vmem:[%s3283_s5 + $0x13c] sm:$0xf0]  ;;  %v1876_v58 = vld [vmem:[%s3283_s5 + $0x254] sm:$0xf0]  ;;  %v1680_v0 = vld [vmem:[%s3283_s5 + $0xcc] sm:$0xf0] }
  0x48   :  { %1165 = vmatpush.bf16.msra.mxu0 %v1759_v45  ;;  %v1846_v2 = vld [vmem:[%s3283_s5 + $0x200] sm:$0xf]  ;;  %v2098_v9 = vld [vmem:[%s3283_s5 + $0x90] sm:$0xf0]  ;;  %v2081_v29 = vld [vmem:[%s3283_s5 + $0xc] sm:$0xf] }
  0x49   :  { %1178 = vmatpush.bf16.msra.mxu1 %v1983_v32  ;;  %v1647_v32 = vor.u32 %v2094_v22, %v1644_v23  ;;  %1157 = vmatpush.bf16.msrb.mxu3 %v1839_v36  ;;  %v1958_v22 = vld [vmem:[%s3283_s5 + $0x2e0] sm:$0xf]  ;;  %v2175_v23 = vld [vmem:[%s3283_s5 + $0x2f8] sm:$0xf0]  ;;  %v2165_v36 = vld [vmem:[%s3283_s5 + $0x2ac] sm:$0xf] }
  0x4a   :  { %vm1366_vm2 = vmor %vm1365_vm0, %vm1342_vm1  ;;  %vm1346_vm3 = vcmask 1042434   ;;  %vm1368_vm5 = vcmask 1043459   ;;  %vm1352_vm7 = vcmask 1044484   ;;  %vm1371_vm9 = vcmask 1045509   ;;  %s1383_s1 = sshll.u32 %s3285_s7, 4  ;;  %s1384_s1 = int_to_ptr.hbm [resolvable:$true] %s1383_s1 }
  0x4b   :  { %1144 = vmatpush.bf16.msrb.mxu2 %v1615_v50  ;;  %vm1367_vm4 = vmor %vm1346_vm3, %vm1366_vm2  ;;  %vm1350_vm10 = vcmask 1041408   ;;  %vm1356_vm11 = vcmask 1046534   ;;  %vm1373_vm13 = vcmask 129030   ;;  %vm1360_vm14 = vcmask 1045508  }
  0x4c   :  { %1166 = vmatpush.bf16.msra.mxu0 %v1731_v56  ;;  %v2083_v56 = vld [vmem:[%s3283_s5 + $0x18] sm:$0xf0]  ;;  %vm1369_vm6 = vmor %vm1368_vm5, %vm1367_vm4  ;;  %vm1362_vm15 = vcmask 1043456  }
  0x4d   :  { %1179 = vmatpush.bf16.msra.mxu1 %v1955_v48  ;;  %v1587_v10 = vor.u32 %v2083_v56, %v1586_v55  ;;  %v2154_v55 = vld [vmem:[%s3283_s5 + $0x250] sm:$0xf0]  ;;  %vm1370_vm8 = vmor %vm1352_vm7, %vm1369_vm6 }
  0x4e   :  { %v1875_v56 = vor.u32 %v2154_v55, %v1874_v54  ;;  %v2183_v55 = vld [vmem:[%s3283_s5 + $0x338] sm:$0xf0]  ;;  %vm1372_vm12 = vmor %vm1371_vm9, %vm1370_vm8 }
  0x4f   :  { %1145 = vmatpush.bf16.msrb.mxu2 %v1587_v10  ;;  %vm1374_vm0 = vmor %vm1373_vm13, %vm1372_vm12 }
  0x50   :  { %1167 = vmatpush.bf16.msra.mxu0 %v1703_v5  ;;  %v2015_v5 = vor.u32 %v2189_v49, %v2014_v47  ;;  %v2112_v49 = vld [vmem:[%s3283_s5 + $0x100] sm:$0xf0] }
  0x51   :  { %1180 = vmatpush.bf16.msra.mxu1 %v1927_v62  ;;  %v1811_v62 = vor.u32 %v2139_v43, %v1810_v42  ;;  %v1902_v42 = vld [vmem:[%s3283_s5 + $0x270] sm:$0xf]  ;;  %v2161_v43 = vld [vmem:[%s3283_s5 + $0x288] sm:$0xf0] }
  0x52   :  { %v1903_v46 = vor.u32 %v2161_v43, %v1902_v42  ;;  %v2187_v42 = vld [vmem:[%s3283_s5 + $0x35c] sm:$0xf]  ;;  %v2024_v43 = vld [vmem:[%s3283_s5 + $0x374] sm:$0xf0] }
  0x53   :  { %1158 = vmatpush.bf16.msrb.mxu3 %v1811_v62 }
  0x54   :  { %1168 = vmatpush.bf16.msra.mxu0 %v1675_v18  ;;  %v2123_v18 = vld [vmem:[%s3283_s5 + $0x15c] sm:$0xf] }
  0x55   :  { %1181 = vmatpush.bf16.msra.mxu1 %v1899_v11  ;;  %v2179_v11 = vld [vmem:[%s3283_s5 + $0x31c] sm:$0xf]  ;;  %v1767_v27 = vor.u32 %v2123_v18, %v1764_v19  ;;  %v1820_v18 = vld [vmem:[%s3283_s5 + $0x1e4] sm:$0xf0] }
  0x56   :  { %v1991_v21 = vor.u32 %v2179_v11, %v1988_v12  ;;  %v2095_v11 = vld [vmem:[%s3283_s5 + $0x7c] sm:$0xf]  ;;  %v1652_v12 = vld [vmem:[%s3283_s5 + $0x94] sm:$0xf0] }
  0x58   :  { %1169 = vmatpush.bf16.msra.mxu0 %v1647_v32  ;;  %v1959_v32 = vor.u32 %v2175_v23, %v1958_v22  ;;  %v2088_v23 = vld [vmem:[%s3283_s5 + $0x44] sm:$0xf] }
  0x59   :  { %1182 = vmatpush.bf16.msra.mxu1 %v1871_v25  ;;  %v1960_v25 = vld [vmem:[%s3283_s5 + $0x2fc] sm:$0xf0] }
  0x5c   :  { %1170 = vmatpush.bf16.msra.mxu0 %v1619_v52  ;;  %v1708_v52 = vld [vmem:[%s3283_s5 + $0x104] sm:$0xf0] }
  0x5d   :  { %1183 = vmatpush.bf16.msra.mxu1 %v1843_v41  ;;  %v1935_v41 = vor.u32 %v2165_v36, %v1932_v37 }
  0x60   :  { %1171 = vmatpush.bf16.msra.mxu0 %v1591_v13  ;;  %v1655_v13 = vor.u32 %v2095_v11, %v1652_v12  ;;  %v2127_v12 = vld [vmem:[%s3283_s5 + $0x178] sm:$0xf0] }
  0x61   :  { %1184 = vmatpush.bf16.msra.mxu1 %v1815_v63  ;;  %v2102_v63 = vld [vmem:[%s3283_s5 + $0xb4] sm:$0xf] }
  0x62   :  { %v1683_v1 = vor.u32 %v2102_v63, %v1680_v0 }
  0xa0   :  { %v139_v30 = vpop.f32.mrf.mxu0 }
  0xa1   :  { %v140_v34 = vadd.f32 %v139_v30, %v46_v16  ;;  %v152_v35 = vpop.f32.mrf.mxu1  ;;  %v1762_v16 = vld [vmem:[%s3283_s5 + $0x158] sm:$0xf]  ;;  %v2116_v30 = vld [vmem:[%s3283_s5 + $0x124] sm:$0xf] }
  0xa2   :  { %v153_v40 = vadd.f32 %v152_v35, %v47_v24  ;;  %v2172_v24 = vld [vmem:[%s3283_s5 + $0x2e4] sm:$0xf]  ;;  %v1763_v26 = vor.u32 %v2126_v17, %v1762_v16  ;;  %v1739_v39 = vor.u32 %v2116_v30, %v1736_v31  ;;  %v2137_v17 = vld [vmem:[%s3283_s5 + $0x1cc] sm:$0xf]  ;;  %v1596_v30 = vld [vmem:[%s3283_s5 + $0x24] sm:$0xf0] }
  0xa3   :  { %v156_v45 = vmul.f32 0.2, %v140_v34  ;;  %v1963_v33 = vor.u32 %v2172_v24, %v1960_v25  ;;  %v2168_v35 = vld [vmem:[%s3283_s5 + $0x2c0] sm:$0xf0]  ;;  %v1823_v19 = vor.u32 %v2137_v17, %v1820_v18  ;;  %v1624_v24 = vld [vmem:[%s3283_s5 + $0x5c] sm:$0xf0]  ;;  %v1599_v31 = vor.u32 %v2081_v29, %v1596_v30 }
  0xa4   :  { %v157_v48 = vmul.f32 0.2, %v153_v40  ;;  %v1627_v25 = vor.u32 %v2088_v23, %v1624_v24  ;;  %v1938_v17 = vld [vmem:[%s3283_s5 + $0x2b0] sm:$0xf]  ;;  %v2169_v18 = vld [vmem:[%s3283_s5 + $0x2c8] sm:$0xf0] }
  0xa5   :  { %v158_v53 = vmax.f32 %v140_v34, %v156_v45  ;;  %v1930_v34 = vld [vmem:[%s3283_s5 + $0x2a8] sm:$0xf]  ;;  %v1904_v45 = vld [vmem:[%s3283_s5 + $0x28c] sm:$0xf0]  ;;  %v2120_v24 = vld [vmem:[%s3283_s5 + $0x140] sm:$0xf0] }
  0xa6   :  { %v159_v57 = vmax.f32 %v153_v40, %v157_v48  ;;  %v1931_v40 = vor.u32 %v2168_v35, %v1930_v34  ;;  %v1907_v47 = vor.u32 %v2158_v44, %v1904_v45  ;;  %v1706_v48 = vld [vmem:[%s3283_s5 + $0xe8] sm:$0xf]  ;;  %v1910_v29 = vld [vmem:[%s3283_s5 + $0x278] sm:$0xf]  ;;  %v2162_v30 = vld [vmem:[%s3283_s5 + $0x290] sm:$0xf0] }
  0xa7   :  { %v160_v61 = vpack.c.bf16 %v158_v53, %v158_v53  ;;  %v1707_v50 = vor.u32 %v2112_v49, %v1706_v48  ;;  %v1711_v53 = vor.u32 %v2109_v51, %v1708_v52  ;;  %v1994_v51 = vld [vmem:[%s3283_s5 + $0x320] sm:$0xf]  ;;  %v1742_v23 = vld [vmem:[%s3283_s5 + $0x128] sm:$0xf] }
  0xa8   :  { %v141_v3 = vpop.f32.mrf.mxu0  ;;  %v161_v4 = vpack.c.bf16 %v159_v57, %v159_v57  ;;  %v2151_v57 = vld [vmem:[%s3283_s5 + $0x23c] sm:$0xf]  ;;  %v1995_v63 = vor.u32 %v2183_v55, %v1994_v51  ;;  %v2148_v55 = vld [vmem:[%s3283_s5 + $0x220] sm:$0xf0] }
  0xa9   :  { %v154_v8 = vpop.f32.mrf.mxu1  ;;  %368 = vmatmul.bf16.vlgmr.msra.gmra.mxu2 %v160_v61  ;;  %394 = vmatmul.bf16.vlgmr.msrb.gmra.mxu0 %v160_v61  ;;  %v1879_v59 = vor.u32 %v2151_v57, %v1876_v58  ;;  %v2105_v61 = vld [vmem:[%s3283_s5 + $0xc8] sm:$0xf0]  ;;  %v2147_v3 = vld [vmem:[%s3283_s5 + $0x218] sm:$0xf0]  ;;  %v1996_v57 = vld [vmem:[%s3283_s5 + $0x33c] sm:$0xf0] }
  0xaa   :  { %381 = vmatmul.bf16.vlgmr.msra.gmra.mxu3 %v161_v4  ;;  %407 = vmatmul.bf16.vlgmr.msrb.gmra.mxu1 %v161_v4  ;;  %v1679_v62 = vor.u32 %v2105_v61, %v1678_v60  ;;  %v1847_v4 = vor.u32 %v2147_v3, %v1846_v2  ;;  %v1650_v8 = vld [vmem:[%s3283_s5 + $0x78] sm:$0xf]  ;;  %v2131_v61 = vld [vmem:[%s3283_s5 + $0x19c] sm:$0xf]  ;;  %v2176_v3 = vld [vmem:[%s3283_s5 + $0x300] sm:$0xf0] }
  0xab   :  { %1203 = vmatpush.bf16.msra.mxu3 %v2015_v5  ;;  %1229 = vmatpush.bf16.msrb.mxu1 %v2019_v6  ;;  %v2144_v5 = vld [vmem:[%s3283_s5 + $0x204] sm:$0xf]  ;;  %v1848_v6 = vld [vmem:[%s3283_s5 + $0x21c] sm:$0xf0]  ;;  %v1651_v10 = vor.u32 %v2098_v9, %v1650_v8  ;;  %v1798_v58 = vld [vmem:[%s3283_s5 + $0x198] sm:$0xf] }
  0xac   :  { %1190 = vmatpush.bf16.msra.mxu2 %v1791_v14  ;;  %1216 = vmatpush.bf16.msrb.mxu0 %v1795_v15  ;;  %v1851_v7 = vor.u32 %v2144_v5, %v1848_v6  ;;  %v1818_v14 = vld [vmem:[%s3283_s5 + $0x1c8] sm:$0xf]  ;;  %v2140_v15 = vld [vmem:[%s3283_s5 + $0x1e0] sm:$0xf0]  ;;  %v1770_v9 = vld [vmem:[%s3283_s5 + $0x160] sm:$0xf] }
  0xad   :  { %v1819_v16 = vor.u32 %v2140_v15, %v1818_v14  ;;  %v1968_v5 = vld [vmem:[%s3283_s5 + $0x304] sm:$0xf0]  ;;  %v1772_v14 = vld [vmem:[%s3283_s5 + $0x17c] sm:$0xf0] }
  0xaf   :  { %1204 = vmatpush.bf16.msra.mxu3 %v1987_v20  ;;  %1230 = vmatpush.bf16.msrb.mxu1 %v1991_v21  ;;  %v1622_v20 = vld [vmem:[%s3283_s5 + $0x40] sm:$0xf]  ;;  %v2091_v21 = vld [vmem:[%s3283_s5 + $0x58] sm:$0xf0] }
  0xb0   :  { %1191 = vmatpush.bf16.msra.mxu2 %v1763_v26  ;;  %1217 = vmatpush.bf16.msrb.mxu0 %v1767_v27  ;;  %v1623_v22 = vor.u32 %v2091_v21, %v1622_v20  ;;  %v1594_v26 = vld [vmem:[%s3283_s5 + $0x8] sm:$0xf]  ;;  %v2084_v27 = vld [vmem:[%s3283_s5 + $0x20] sm:$0xf0]  ;;  %v1940_v20 = vld [vmem:[%s3283_s5 + $0x2cc] sm:$0xf0]  ;;  %v1771_v21 = vor.u32 %v2127_v12, %v1770_v9 }
  0xb1   :  { %v1595_v28 = vor.u32 %v2084_v27, %v1594_v26  ;;  %v1744_v26 = vld [vmem:[%s3283_s5 + $0x144] sm:$0xf0]  ;;  %v1939_v27 = vor.u32 %v2169_v18, %v1938_v17  ;;  %v2191_v9 = vld [vmem:[%s3283_s5 + $0x378] sm:$0xf0]  ;;  %v2092_v12 = vld [vmem:[%s3283_s5 + $0x60] sm:$0xf0] }
  0xb3   :  { %1205 = vmatpush.bf16.msra.mxu3 %v1959_v32  ;;  %1231 = vmatpush.bf16.msrb.mxu1 %v1963_v33  ;;  %v194_v32 = vld [vmem:[%s3282_s4] sm:$0x3] }
  0xb4   :  { %1192 = vmatpush.bf16.msra.mxu2 %v1735_v38  ;;  %1218 = vmatpush.bf16.msrb.mxu0 %v1739_v39  ;;  %v197_v33 = vperm.slane %v194_v32, 1  ;;  %v196_v38 = vperm.slane %v194_v32, 0  ;;  %v2022_v39 = vld [vmem:[%s3283_s5 + $0x358] sm:$0xf] }
  0xb5   :  { %v1912_v32 = vld [vmem:[%s3283_s5 + $0x294] sm:$0xf0] }
  0xb7   :  { %1206 = vmatpush.bf16.msra.mxu3 %v1931_v40  ;;  %1232 = vmatpush.bf16.msrb.mxu1 %v1935_v41  ;;  %v2190_v40 = vld [vmem:[%s3283_s5 + $0x370] sm:$0xf0] }
  0xb8   :  { %1193 = vmatpush.bf16.msra.mxu2 %v1707_v50  ;;  %1219 = vmatpush.bf16.msrb.mxu0 %v1711_v53  ;;  %v2023_v49 = vor.u32 %v2190_v40, %v2022_v39  ;;  %v2027_v50 = vor.u32 %v2187_v42, %v2024_v43  ;;  %v1911_v39 = vor.u32 %v2162_v30, %v1910_v29  ;;  %v2155_v42 = vld [vmem:[%s3283_s5 + $0x258] sm:$0xf0]  ;;  %v2152_v43 = vld [vmem:[%s3283_s5 + $0x244] sm:$0xf] }
  0xbb   :  { %1207 = vmatpush.bf16.msra.mxu3 %v1903_v46  ;;  %1233 = vmatpush.bf16.msrb.mxu1 %v1907_v47 }
  0xbc   :  { %1194 = vmatpush.bf16.msra.mxu2 %v1679_v62  ;;  %1220 = vmatpush.bf16.msrb.mxu0 %v1683_v1  ;;  %v1800_v62 = vld [vmem:[%s3283_s5 + $0x1b4] sm:$0xf0]  ;;  %v1966_v1 = vld [vmem:[%s3283_s5 + $0x2e8] sm:$0xf] }
  0xbd   :  { %v1803_v8 = vor.u32 %v2131_v61, %v1800_v62  ;;  %v1967_v15 = vor.u32 %v2176_v3, %v1966_v1  ;;  %v2099_v61 = vld [vmem:[%s3283_s5 + $0x98] sm:$0xf0]  ;;  %v2096_v62 = vld [vmem:[%s3283_s5 + $0x84] sm:$0xf]  ;;  %v2141_v3 = vld [vmem:[%s3283_s5 + $0x1e8] sm:$0xf0] }
  0xbf   :  { %1208 = vmatpush.bf16.msra.mxu3 %v1875_v56  ;;  %1234 = vmatpush.bf16.msrb.mxu1 %v1879_v59  ;;  %v2180_v56 = vld [vmem:[%s3283_s5 + $0x324] sm:$0xf]  ;;  %v2134_v59 = vld [vmem:[%s3283_s5 + $0x1b0] sm:$0xf0] }
  0xc0   :  { %1195 = vmatpush.bf16.msra.mxu2 %v1651_v10  ;;  %1221 = vmatpush.bf16.msrb.mxu0 %v1655_v13  ;;  %v1999_v0 = vor.u32 %v2180_v56, %v1996_v57  ;;  %v2124_v13 = vld [vmem:[%s3283_s5 + $0x164] sm:$0xf]  ;;  %v2145_v56 = vld [vmem:[%s3283_s5 + $0x20c] sm:$0xf]  ;;  %v1856_v57 = vld [vmem:[%s3283_s5 + $0x224] sm:$0xf0] }
  0xc1   :  { %v1859_v1 = vor.u32 %v2145_v56, %v1856_v57  ;;  %v1862_v56 = vld [vmem:[%s3283_s5 + $0x210] sm:$0xf]  ;;  %v2149_v57 = vld [vmem:[%s3283_s5 + $0x228] sm:$0xf0] }
  0xc3   :  { %1209 = vmatpush.bf16.msra.mxu3 %v1847_v4  ;;  %1235 = vmatpush.bf16.msrb.mxu1 %v1851_v7  ;;  %v2173_v4 = vld [vmem:[%s3283_s5 + $0x2ec] sm:$0xf]  ;;  %v1799_v7 = vor.u32 %v2134_v59, %v1798_v58 }
  0xc4   :  { %1196 = vmatpush.bf16.msra.mxu2 %v1623_v22  ;;  %1222 = vmatpush.bf16.msrb.mxu0 %v1627_v25  ;;  %v1775_v22 = vor.u32 %v2124_v13, %v1772_v14  ;;  %v2117_v25 = vld [vmem:[%s3283_s5 + $0x12c] sm:$0xf]  ;;  %v1632_v14 = vld [vmem:[%s3283_s5 + $0x64] sm:$0xf0] }
  0xc5   :  { %v2089_v13 = vld [vmem:[%s3283_s5 + $0x4c] sm:$0xf] }
  0xc7   :  { %1210 = vmatpush.bf16.msra.mxu3 %v1819_v16  ;;  %1236 = vmatpush.bf16.msrb.mxu1 %v1823_v19  ;;  %v1971_v16 = vor.u32 %v2173_v4, %v1968_v5  ;;  %v2166_v19 = vld [vmem:[%s3283_s5 + $0x2b4] sm:$0xf]  ;;  %v1828_v5 = vld [vmem:[%s3283_s5 + $0x1ec] sm:$0xf0] }
  0xc8   :  { %1197 = vmatpush.bf16.msra.mxu2 %v1595_v28  ;;  %1223 = vmatpush.bf16.msrb.mxu0 %v1599_v31  ;;  %v1943_v28 = vor.u32 %v2166_v19, %v1940_v20  ;;  %v2159_v31 = vld [vmem:[%s3283_s5 + $0x27c] sm:$0xf]  ;;  %v2138_v4 = vld [vmem:[%s3283_s5 + $0x1d4] sm:$0xf]  ;;  %v1635_v19 = vor.u32 %v2089_v13, %v1632_v14  ;;  %v2002_v20 = vld [vmem:[%s3283_s5 + $0x328] sm:$0xf] }
  0xc9   :  { %v1915_v40 = vor.u32 %v2159_v31, %v1912_v32  ;;  %v1974_v31 = vld [vmem:[%s3283_s5 + $0x2f0] sm:$0xf]  ;;  %v2177_v32 = vld [vmem:[%s3283_s5 + $0x308] sm:$0xf0] }
 0x126   :  { %v395_v34 = vpop.f32.mrf.mxu0 }
 0x127   :  { %v396_v35 = vadd.f32 %v395_v34, %v197_v33  ;;  %v408_v36 = vpop.f32.mrf.mxu1  ;;  %v1743_v33 = vor.u32 %v2120_v24, %v1742_v23  ;;  %v1747_v34 = vor.u32 %v2117_v25, %v1744_v26  ;;  %v2085_v23 = vld [vmem:[%s3283_s5 + $0x28] sm:$0xf0]  ;;  %v2082_v24 = vld [vmem:[%s3283_s5 + $0x14] sm:$0xf]  ;;  %v1604_v25 = vld [vmem:[%s3283_s5 + $0x2c] sm:$0xf0] }
 0x128   :  { %v1806_v26 = vld [vmem:[%s3283_s5 + $0x1a0] sm:$0xf]  ;;  %v1607_v30 = vor.u32 %v2082_v24, %v1604_v25 }
 0x129   :  { %v409_v37 = vadd.f32 %v408_v36, %v396_v35  ;;  %v1714_v35 = vld [vmem:[%s3283_s5 + $0xf0] sm:$0xf]  ;;  %v2113_v36 = vld [vmem:[%s3283_s5 + $0x108] sm:$0xf0] }
 0x12b   :  { %v413_v41 = vmul.f32 0.2, %v409_v37 }
 0x12c   :  { %v369_v44 = vpop.f32.mrf.mxu2 }
 0x12d   :  { %v415_v45 = vmax.f32 %v409_v37, %v413_v41  ;;  %v370_v46 = vadd.f32 %v369_v44, %v196_v38  ;;  %v382_v47 = vpop.f32.mrf.mxu3  ;;  %v2110_v37 = vld [vmem:[%s3283_s5 + $0xf4] sm:$0xf]  ;;  %v1716_v38 = vld [vmem:[%s3283_s5 + $0x10c] sm:$0xf0]  ;;  %v1882_v41 = vld [vmem:[%s3283_s5 + $0x240] sm:$0xf] }
 0x12e   :  { %v397_v48 = vpop.f32.mrf.mxu0  ;;  %v1884_v44 = vld [vmem:[%s3283_s5 + $0x25c] sm:$0xf0]  ;;  %v1883_v51 = vor.u32 %v2155_v42, %v1882_v41  ;;  %v2121_v41 = vld [vmem:[%s3283_s5 + $0x148] sm:$0xf0] }
 0x12f   :  { %v2970_v52 = vpack.c.bf16 %v415_v45, %v415_v45  ;;  %v383_v53 = vadd.f32 %v382_v47, %v370_v46  ;;  %v410_v54 = vpop.f32.mrf.mxu1  ;;  %v1715_v45 = vor.u32 %v2113_v36, %v1714_v35  ;;  %v1719_v46 = vor.u32 %v2110_v37, %v1716_v38  ;;  %v1686_v47 = vld [vmem:[%s3283_s5 + $0xb8] sm:$0xf]  ;;  %v2106_v48 = vld [vmem:[%s3283_s5 + $0xd0] sm:$0xf0]  ;;  %v2128_v35 = vld [vmem:[%s3283_s5 + $0x180] sm:$0xf0] }
 0x130   :  { %v1854_v54 = vld [vmem:[%s3283_s5 + $0x208] sm:$0xf]  ;;  %v1687_v58 = vor.u32 %v2106_v48, %v1686_v47  ;;  %v1975_v36 = vor.u32 %v2177_v32, %v1974_v31  ;;  %v1946_v37 = vld [vmem:[%s3283_s5 + $0x2b8] sm:$0xf]  ;;  %v2170_v38 = vld [vmem:[%s3283_s5 + $0x2d0] sm:$0xf0] }
 0x131   :  { %v412_v60 = vmul.f32 0.2, %v383_v53  ;;  %1159 = vmatmul.bf16.vlgmr.msrb.gmra.mxu3 %v2970_v52  ;;  %1185 = vmatmul.bf16.vlgmr.msra.gmra.mxu1 %v2970_v52  ;;  %v1947_v42 = vor.u32 %v2170_v38, %v1946_v37  ;;  %v2114_v47 = vld [vmem:[%s3283_s5 + $0x110] sm:$0xf0] }
 0x132   :  { %1255 = vmatpush.bf16.msrb.mxu3 %v2023_v49  ;;  %1281 = vmatpush.bf16.msra.mxu1 %v2027_v50  ;;  %v2103_v49 = vld [vmem:[%s3283_s5 + $0xbc] sm:$0xf]  ;;  %v1688_v50 = vld [vmem:[%s3283_s5 + $0xd4] sm:$0xf0] }
 0x133   :  { %v414_v2 = vmax.f32 %v383_v53, %v412_v60  ;;  %v1887_v53 = vor.u32 %v2152_v43, %v1884_v44  ;;  %v1691_v59 = vor.u32 %v2103_v49, %v1688_v50  ;;  %v1658_v60 = vld [vmem:[%s3283_s5 + $0x80] sm:$0xf]  ;;  %v2163_v44 = vld [vmem:[%s3283_s5 + $0x298] sm:$0xf0]  ;;  %v1890_v49 = vld [vmem:[%s3283_s5 + $0x248] sm:$0xf] }
 0x134   :  { %v371_v6 = vpop.f32.mrf.mxu2  ;;  %v1918_v43 = vld [vmem:[%s3283_s5 + $0x280] sm:$0xf]  ;;  %v2156_v50 = vld [vmem:[%s3283_s5 + $0x260] sm:$0xf0] }
 0x135   :  { %v3010_v10 = vpack.c.bf16 %v414_v2, %v414_v2  ;;  %v384_v11 = vpop.f32.mrf.mxu3  ;;  %v1826_v2 = vld [vmem:[%s3283_s5 + $0x1d0] sm:$0xf]  ;;  %v1659_v6 = vor.u32 %v2099_v61, %v1658_v60  ;;  %v1919_v48 = vor.u32 %v2163_v44, %v1918_v43  ;;  %v2100_v60 = vld [vmem:[%s3283_s5 + $0xa0] sm:$0xf0]  ;;  %v1863_v61 = vor.u32 %v2149_v57, %v1862_v56 }
 0x136   :  { %1256 = vmatpush.bf16.msrb.mxu3 %v1995_v63  ;;  %1282 = vmatpush.bf16.msra.mxu1 %v1999_v0  ;;  %v1660_v63 = vld [vmem:[%s3283_s5 + $0x9c] sm:$0xf0]  ;;  %v1855_v0 = vor.u32 %v2148_v55, %v1854_v54  ;;  %v1630_v11 = vld [vmem:[%s3283_s5 + $0x48] sm:$0xf]  ;;  %v2107_v54 = vld [vmem:[%s3283_s5 + $0xd8] sm:$0xf0]  ;;  %v1891_v55 = vor.u32 %v2156_v50, %v1890_v49 }
 0x137   :  { %1146 = vmatmul.bf16.vlgmr.msrb.gmra.mxu2 %v3010_v10  ;;  %1172 = vmatmul.bf16.vlgmr.msra.gmra.mxu0 %v3010_v10  ;;  %v1631_v18 = vor.u32 %v2092_v12, %v1630_v11 }
 0x138   :  { %1242 = vmatpush.bf16.msrb.mxu2 %v1799_v7  ;;  %1268 = vmatpush.bf16.msra.mxu0 %v1803_v8  ;;  %v1663_v7 = vor.u32 %v2096_v62, %v1660_v63  ;;  %v2030_v8 = vld [vmem:[%s3283_s5 + $0x360] sm:$0xf]  ;;  %v1834_v62 = vld [vmem:[%s3283_s5 + $0x1d8] sm:$0xf]  ;;  %v2142_v63 = vld [vmem:[%s3283_s5 + $0x1f0] sm:$0xf0] }
 0x139   :  { %v2031_v17 = vor.u32 %v2191_v9, %v2030_v8  ;;  %v546_v9 = vld [vmem:[%s3284_s6] sm:$0x7f] }
 0x13a   :  { %1257 = vmatpush.bf16.msrb.mxu3 %v1967_v15  ;;  %1283 = vmatpush.bf16.msra.mxu1 %v1971_v16  ;;  %v1827_v15 = vor.u32 %v2141_v3, %v1826_v2  ;;  %v1831_v16 = vor.u32 %v2138_v4, %v1828_v5  ;;  %v2093_v2 = vld [vmem:[%s3283_s5 + $0x68] sm:$0xf0]  ;;  %v1835_v3 = vor.u32 %v2142_v63, %v1834_v62  ;;  %v1610_v5 = vld [vmem:[%s3283_s5 + $0x18] sm:$0xf]  ;;  %v549_v11 = vperm.slane %v546_v9, 1 }
 0x13b   :  { %v552_v43 = vperm.slane %v546_v9, 4 }
 0x13c   :  { %1243 = vmatpush.bf16.msrb.mxu2 %v1771_v21  ;;  %1269 = vmatpush.bf16.msra.mxu0 %v1775_v22  ;;  %v2184_v21 = vld [vmem:[%s3283_s5 + $0x340] sm:$0xf0]  ;;  %v1602_v22 = vld [vmem:[%s3283_s5 + $0x10] sm:$0xf] }
 0x13d   :  { %v1603_v29 = vor.u32 %v2085_v23, %v1602_v22 }
 0x13e   :  { %1258 = vmatpush.bf16.msrb.mxu3 %v1939_v27  ;;  %1284 = vmatpush.bf16.msra.mxu1 %v1943_v28  ;;  %v2135_v27 = vld [vmem:[%s3283_s5 + $0x1b8] sm:$0xf0]  ;;  %v2003_v28 = vor.u32 %v2184_v21, %v2002_v20 }
 0x140   :  { %1244 = vmatpush.bf16.msrb.mxu2 %v1743_v33  ;;  %1270 = vmatpush.bf16.msra.mxu0 %v1747_v34  ;;  %v1807_v33 = vor.u32 %v2135_v27, %v1806_v26  ;;  %v1778_v34 = vld [vmem:[%s3283_s5 + $0x168] sm:$0xf] }
 0x141   :  { %1211 = vmatmul.bf16.vlgmr.msra.gmra.mxu3 %v2970_v52  ;;  %1237 = vmatmul.bf16.vlgmr.msrb.gmra.mxu1 %v2970_v52 }
 0x142   :  { %1259 = vmatpush.bf16.msrb.mxu3 %v1911_v39  ;;  %1285 = vmatpush.bf16.msra.mxu1 %v1915_v40  ;;  %v1779_v39 = vor.u32 %v2128_v35, %v1778_v34  ;;  %v1750_v40 = vld [vmem:[%s3283_s5 + $0x130] sm:$0xf] }
 0x144   :  { %1245 = vmatpush.bf16.msrb.mxu2 %v1715_v45  ;;  %1271 = vmatpush.bf16.msra.mxu0 %v1719_v46  ;;  %v1751_v45 = vor.u32 %v2121_v41, %v1750_v40  ;;  %v1722_v46 = vld [vmem:[%s3283_s5 + $0xf8] sm:$0xf]  ;;  %v550_v41 = vperm.slane %v546_v9, 2 }
 0x146   :  { %1260 = vmatpush.bf16.msrb.mxu3 %v1883_v51  ;;  %1286 = vmatpush.bf16.msra.mxu1 %v1887_v53  ;;  %v1723_v51 = vor.u32 %v2114_v47, %v1722_v46  ;;  %v1694_v53 = vld [vmem:[%s3283_s5 + $0xc0] sm:$0xf] }
 0x147   :  { %1198 = vmatmul.bf16.vlgmr.msra.gmra.mxu2 %v3010_v10  ;;  %1224 = vmatmul.bf16.vlgmr.msrb.gmra.mxu0 %v3010_v10 }
 0x148   :  { %1246 = vmatpush.bf16.msrb.mxu2 %v1687_v58  ;;  %1272 = vmatpush.bf16.msra.mxu0 %v1691_v59  ;;  %v1695_v58 = vor.u32 %v2107_v54, %v1694_v53  ;;  %v1666_v59 = vld [vmem:[%s3283_s5 + $0x88] sm:$0xf] }
 0x14a   :  { %1261 = vmatpush.bf16.msrb.mxu3 %v1855_v0  ;;  %1287 = vmatpush.bf16.msra.mxu1 %v1859_v1  ;;  %v1667_v0 = vor.u32 %v2100_v60, %v1666_v59  ;;  %v1638_v1 = vld [vmem:[%s3283_s5 + $0x50] sm:$0xf] }
 0x14b   :  { %v1639_v4 = vor.u32 %v2093_v2, %v1638_v1 }
 0x14c   :  { %1247 = vmatpush.bf16.msrb.mxu2 %v1659_v6  ;;  %1273 = vmatpush.bf16.msra.mxu0 %v1663_v7  ;;  %v2086_v6 = vld [vmem:[%s3283_s5 + $0x30] sm:$0xf0]  ;;  %s2233_s5 = smov [#allocation2]  }
 0x14d   :  { %v1611_v7 = vor.u32 %v2086_v6, %v1610_v5  ;;  %s1381_s6 = sshll.u32 %s2233_s5, 4  ;;  %s1382_s6 = int_to_ptr.vmem [resolvable:$true] %s1381_s6 }
 0x14e   :  { %1262 = vmatpush.bf16.msrb.mxu3 %v1827_v15  ;;  %1288 = vmatpush.bf16.msra.mxu1 %v1831_v16 }
 0x150   :  { %1248 = vmatpush.bf16.msrb.mxu2 %v1631_v18  ;;  %1274 = vmatpush.bf16.msra.mxu0 %v1635_v19 }
 0x151   :  { %1263 = vmatmul.bf16.vlgmr.msrb.gmra.mxu3 %v2970_v52  ;;  %1289 = vmatmul.bf16.vlgmr.msra.gmra.mxu1 %v2970_v52 }
 0x152   :  { %1307 = vmatpush.bf16.msra.mxu3 %v2031_v17  ;;  %v548_v17 = vperm.slane %v546_v9, 0 }
 0x154   :  { %1249 = vmatpush.bf16.msrb.mxu2 %v1603_v29  ;;  %1275 = vmatpush.bf16.msra.mxu0 %v1607_v30 }
 0x156   :  { %1308 = vmatpush.bf16.msra.mxu3 %v2003_v28 }
 0x157   :  { %1250 = vmatmul.bf16.vlgmr.msrb.gmra.mxu2 %v3010_v10  ;;  %1276 = vmatmul.bf16.vlgmr.msra.gmra.mxu0 %v3010_v10 }
 0x158   :  { %1294 = vmatpush.bf16.msra.mxu2 %v1807_v33 }
 0x15a   :  { %1309 = vmatpush.bf16.msra.mxu3 %v1975_v36 }
 0x15c   :  { %1295 = vmatpush.bf16.msra.mxu2 %v1779_v39 }
 0x15e   :  { %1310 = vmatpush.bf16.msra.mxu3 %v1947_v42  ;;  %v551_v42 = vperm.slane %v546_v9, 3 }
 0x160   :  { %1296 = vmatpush.bf16.msra.mxu2 %v1751_v45  ;;  %v553_v45 = vperm.slane %v546_v9, 5 }
 0x162   :  { %1311 = vmatpush.bf16.msra.mxu3 %v1919_v48 }
 0x164   :  { %1297 = vmatpush.bf16.msra.mxu2 %v1723_v51 }
 0x166   :  { %1312 = vmatpush.bf16.msra.mxu3 %v1891_v55  ;;  %v554_v55 = vperm.slane %v546_v9, 6 }
 0x168   :  { %1298 = vmatpush.bf16.msra.mxu2 %v1695_v58 }
 0x16a   :  { %1313 = vmatpush.bf16.msra.mxu3 %v1863_v61 }
 0x16c   :  { %1299 = vmatpush.bf16.msra.mxu2 %v1667_v0 }
 0x16e   :  { %1314 = vmatpush.bf16.msra.mxu3 %v1835_v3 }
 0x170   :  { %1300 = vmatpush.bf16.msra.mxu2 %v1639_v4 }
 0x171   :  { %1315 = vmatmul.bf16.vlgmr.msra.gmra.mxu3 %v2970_v52 }
 0x174   :  { %1301 = vmatpush.bf16.msra.mxu2 %v1611_v7 }
 0x177   :  { %1302 = vmatmul.bf16.vlgmr.msra.gmra.mxu2 %v3010_v10 }
 0x1ae   :  { %v1186_v8 = vpop.f32.mrf.mxu1 }
 0x1b4   :  { %v1160_v12 = vpop.f32.mrf.mxu3  ;;  %v1173_v13 = vpop.f32.mrf.mxu0 }
 0x1b5   :  { %v1174_v14 = vadd.f32 %v1173_v13, %v549_v11 }
 0x1b6   :  { %v1188_v15 = vpop.f32.mrf.mxu1 }
 0x1b7   :  { %v1187_v16 = vadd.f32 %v1186_v8, %v1174_v14 }
 0x1b9   :  { %2193 = vtanh.f32 %v1187_v16 }
 0x1ba   :  { %v1147_v18 = vpop.f32.mrf.mxu2 }
 0x1bb   :  { %v1148_v19 = vadd.f32 %v1147_v18, %v548_v17 }
 0x1bc   :  { %v1162_v20 = vpop.f32.mrf.mxu3  ;;  %v1175_v21 = vpop.f32.mrf.mxu0 }
 0x1bd   :  { %v1161_v52 = vadd.f32 %v1160_v12, %v1148_v19 }
 0x1be   :  { %v1238_v22 = vpop.f32.mrf.mxu1 }
 0x1bf   :  { %2195 = vtanh.f32 %v1161_v52  ;;  %v2194_v23 = vpop.eup %2193 }
 0x1c2   :  { %v1149_v10 = vpop.f32.mrf.mxu2 }
 0x1c4   :  { %v1212_v24 = vpop.f32.mrf.mxu3  ;;  %v1225_v25 = vpop.f32.mrf.mxu0 }
 0x1c5   :  { %v2196_v26 = vpop.eup %2195  ;;  %v1226_v46 = vadd.f32 %v1225_v25, %v551_v42 }
 0x1c6   :  { %v3264_v27 = vpack.c.bf16 %v2194_v23, %v2196_v26  ;;  %v1240_v28 = vpop.f32.mrf.mxu1 }
 0x1c7   :  { %v1239_v50 = vadd.f32 %v1238_v22, %v1226_v46 }
 0x1c8   :  { %v1335_v6 = vrot.slane %v3264_v27, 3 }
 0x1ca   :  { %v1199_v29 = vpop.f32.mrf.mxu2  ;;  %v1345_v14 = vsel %vm1342_vm1, %v3264_v27, %v1335_v6 }
 0x1cb   :  { %v1200_v44 = vadd.f32 %v1199_v29, %v550_v41 }
 0x1cc   :  { %v1214_v30 = vpop.f32.mrf.mxu3  ;;  %v1227_v31 = vpop.f32.mrf.mxu0 }
 0x1cd   :  { %v1213_v48 = vadd.f32 %v1212_v24, %v1200_v44 }
 0x1ce   :  { %v1290_v32 = vpop.f32.mrf.mxu1 }
 0x1cf   :  { %2197 = vtanh.f32 %v1213_v48 }
 0x1d0   :  { %2199 = vtanh.f32 %v1239_v50 }
 0x1d2   :  { %v1201_v33 = vpop.f32.mrf.mxu2 }
 0x1d4   :  { %v1264_v34 = vpop.f32.mrf.mxu3  ;;  %v1277_v35 = vpop.f32.mrf.mxu0 }
 0x1d5   :  { %v1278_v49 = vadd.f32 %v1277_v35, %v553_v45  ;;  %v2198_v59 = vpop.eup %2197 }
 0x1d6   :  { %v1292_v36 = vpop.f32.mrf.mxu1  ;;  %v2200_v61 = vpop.eup %2199 }
 0x1d7   :  { %v1291_v54 = vadd.f32 %v1290_v32, %v1278_v49  ;;  %v1328_v63 = vpack.c.bf16 %v2200_v61, %v2198_v59 }
 0x1d9   :  { %v1336_v3 = vrot.slane %v1328_v63, 6  ;;  %v1337_v4 = vrot.slane %v1328_v63, 1 }
 0x1da   :  { %v1251_v37 = vpop.f32.mrf.mxu2 }
 0x1db   :  { %v1252_v47 = vadd.f32 %v1251_v37, %v552_v43  ;;  %v1349_v13 = vsel %vm1346_vm3, %v1336_v3, %v1337_v4 }
 0x1dc   :  { %v1266_v38 = vpop.f32.mrf.mxu3  ;;  %v1279_v39 = vpop.f32.mrf.mxu0  ;;  %v1351_v17 = vsel %vm1350_vm10, %v1345_v14, %v1349_v13 }
 0x1dd   :  { %v1265_v53 = vadd.f32 %v1264_v34, %v1252_v47 }
 0x1df   :  { %2201 = vtanh.f32 %v1265_v53 }
 0x1e0   :  { %2203 = vtanh.f32 %v1291_v54 }
 0x1e2   :  { %v1253_v40 = vpop.f32.mrf.mxu2 }
 0x1e5   :  { %v2202_v62 = vpop.eup %2201 }
 0x1e6   :  { %v2204_v0 = vpop.eup %2203 }
 0x1e7   :  { %v1329_v1 = vpack.c.bf16 %v2204_v0, %v2202_v62 }
 0x1e9   :  { %v1338_v7 = vrot.slane %v1329_v1, 4  ;;  %v1339_v8 = vrot.slane %v1329_v1, 7 }
 0x1eb   :  { %v1355_v15 = vsel %vm1352_vm7, %v1338_v7, %v1339_v8 }
 0x1f4   :  { %v1316_v51 = vpop.f32.mrf.mxu3 }
 0x1fa   :  { %v1303_v56 = vpop.f32.mrf.mxu2 }
 0x1fb   :  { %v1304_v57 = vadd.f32 %v1303_v56, %v554_v55 }
 0x1fc   :  { %v1318_v58 = vpop.f32.mrf.mxu3 }
 0x1fd   :  { %v1317_v60 = vadd.f32 %v1316_v51, %v1304_v57 }
 0x1ff   :  { %2205 = vtanh.f32 %v1317_v60 }
 0x202   :  { %v1305_v2 = vpop.f32.mrf.mxu2 }
 0x205   :  { %v2206_v5 = vpop.eup %2205 }
 0x206   :  { %v1330_v9 = vpack.c.bf16 %v2206_v5, %v2206_v5 }
 0x208   :  { %v1340_v11 = vrot.slane %v1330_v9, 2  ;;  %v1341_v12 = vrot.slane %v1330_v9, 5 }
 0x20a   :  { %v1359_v16 = vsel %vm1356_vm11, %v1340_v11, %v1341_v12 }
 0x20b   :  { %v1361_v18 = vsel %vm1360_vm14, %v1355_v15, %v1359_v16 }
 0x20c   :  { %v1363_v19 = vsel %vm1362_vm15, %v1351_v17, %v1361_v18 }
 0x20d   :  { %1375 = vst.msk [vmem:[#allocation2] sm:$0x7f] %vm1374_vm0, %v1363_v19 }
 0x20e   :  { %1386 = dma.vmem_to_hbm [thread:$0]  %s1382_s6, 112, %s1384_s1, [#allocation3]  }
 0x20f   :  { %2231 = dma.done.wait [#allocation3], 112  }
 0x210   :  { %2232 = vsyncadd [#allocation3], 4294967184 }
 0x211   :  { %1391 = vsyncpa [#allocation3], 1 }

</bundles_post_ra>
